<compile_context>
chip_gen: v5e
topology: v5e:2x2
jax: 0.10.0
libtpu: 0.0.40
codegen_flags: <defaults>
</compile_context>

<pallas_src>
import functools

import numpy as np

import jax
import jax.numpy as jnp
from jax.experimental import pallas as pl
from jax.experimental.pallas import tpu as pltpu

# Globals referenced by the original PyTorch module.
nonlinearity = "relu"
dropout = 0.5  # identity at inference time


# ---------------------------------------------------------------------------
# Grouped (row-band) kernel: lane-dense path for small/medium wc*cout.
# ---------------------------------------------------------------------------
def _grouped_kernel(x_ref, w_ref, bss_ref, o_ref, xs_ref, *,
                    bblk, h, w, cin, cout, kh, pad, pool,
                    hc, wc, ho, wo, hp):
    """x_ref: (bblk, h, w*cin) bf16; w_ref: (kh, w*cin, wc*cout) banded weights;
    bss_ref: (3, wo*cout) f32 [bias, bn_scale, bn_shift] pre-tiled to output lanes;
    o_ref: (bblk, ho, wo*cout); xs_ref: (bblk, hp, w*cin) VMEM scratch (row-padded input)."""
    cdt = x_ref.dtype

    # Vertical zero-padding staged in VMEM scratch; whole buffer rewritten every step
    # (no cross-step state), interior written with a plain sublane-offset store.
    if pad > 0:
        xs_ref[...] = jnp.zeros((bblk, hp, w * cin), cdt)
        xs_ref[:, pad:pad + h, :] = x_ref[...]
        src = xs_ref
    else:
        src = x_ref

    # Convolution as kh row-band matmuls: K = w*cin, N = wc*cout (lane-dense result).
    acc = None
    for dh in range(kh):
        xrow = src[:, dh:dh + hc, :].reshape(bblk * hc, w * cin)
        part = jnp.dot(xrow, w_ref[dh], preferred_element_type=jnp.float32)
        acc = part if acc is None else acc + part
    y = acc.reshape(bblk, hc, wc * cout)                     # f32, conv result (no bias yet)

    if pool:
        # W-pool: weights were column-permuted to [even pixels | odd pixels], so the 2x1 max
        # is a single half-slice maximum and the result keeps natural pooled-pixel order.
        ne = (wc + 1) // 2                                   # number of even-indexed pixels
        y = jnp.maximum(y[..., :wo * cout], y[..., ne * cout:(ne + wo) * cout])
        # H-pool on the sublane-major axis (floor semantics for odd hc, like F.max_pool2d(x, 2)).
        y = y[:, :2 * ho, :].reshape(bblk, ho, 2, wo * cout)
        y = jnp.maximum(y[:, :, 0, :], y[:, :, 1, :])

    bias, scale, shift = bss_ref[0], bss_ref[1], bss_ref[2]  # each (wo*cout,) f32, pre-tiled
    y = jnp.maximum(y + bias, 0.0)        # bias after pool (commutes with per-channel max) + ReLU
    y = y * scale + shift                 # BatchNorm2d(eps) inference affine (running stats)
    # Dropout(p=dropout) is identity at inference time.
    o_ref[...] = y.astype(o_ref.dtype)


# ---------------------------------------------------------------------------
# Fallback kernel (plain im2col) for shapes where the band weight would be too large.
# ---------------------------------------------------------------------------
def _im2col_kernel(x_ref, w_ref, bss_ref, o_ref, *, bblk, h, w, cin, cout,
                   kh, kw, pad, pool, hc, wc, ho, wo):
    cdt = x_ref.dtype
    x4 = x_ref[...].reshape(bblk, h, w, cin)
    if pad > 0:
        zr = jnp.zeros((bblk, pad, w, cin), cdt)
        x4 = jnp.concatenate([zr, x4, zr], axis=1)
        zc = jnp.zeros((bblk, h + 2 * pad, pad, cin), cdt)
        x4 = jnp.concatenate([zc, x4, zc], axis=2)
    taps = [x4[:, dh:dh + hc, dw:dw + wc, :] for dh in range(kh) for dw in range(kw)]
    patch = taps[0] if len(taps) == 1 else jnp.concatenate(taps, axis=-1)
    patch = patch.reshape(bblk * hc * wc, kh * kw * cin)
    y = jnp.dot(patch, w_ref[...], preferred_element_type=jnp.float32)
    y = y.reshape(bblk, hc, wc, cout)
    if pool:
        hc2, wc2 = hc // 2, wc // 2
        y = y[:, :2 * hc2, :2 * wc2, :]
        y = y.reshape(bblk, hc2, 2, 2 * wc2, cout)
        y = jnp.maximum(y[:, :, 0], y[:, :, 1])
        y = y.reshape(bblk, hc2, wc2, 2 * cout)
        y = jnp.maximum(y[..., :cout], y[..., cout:])
    bss = bss_ref[...]
    y = jnp.maximum(y + bss[0], 0.0)
    y = y * bss[1] + bss[2]
    o_ref[...] = y.reshape(bblk, ho, wo * cout).astype(o_ref.dtype)


# ---------------------------------------------------------------------------
# Host-side helpers.
# ---------------------------------------------------------------------------
def _band_weights(w_oihw, *, wc, w, pad, pool, compute_dtype):
    """Banded weights (kh, w*cin, wc*cout): every output column of a row in one contraction.
    Horizontal zero-padding is folded in (padded columns have no rows). If `pool`, output
    columns are permuted to [even pixels | odd pixels] so the W-pool is a half-slice max."""
    cout, cin, kh, kw = w_oihw.shape
    w_hwio = jnp.transpose(w_oihw, (2, 3, 1, 0))             # (kh, kw, cin, cout)
    if pool:
        perm = np.concatenate([np.arange(0, wc, 2), np.arange(1, wc, 2)])
    else:
        perm = np.arange(wc)
    cu = np.arange(w)                                        # unpadded input column
    dw = (cu[:, None] + pad) - perm[None, :]                 # (w, wc) tap index per (col, slot)
    valid = (dw >= 0) & (dw < kw)
    dwc = np.clip(dw, 0, kw - 1)
    band = w_hwio[:, dwc, :, :]                              # (kh, w, wc, cin, cout)
    band = band * jnp.asarray(valid, w_hwio.dtype)[None, :, :, None, None]
    band = jnp.transpose(band, (0, 1, 3, 2, 4))              # (kh, w, cin, wc, cout)
    return band.reshape(kh, w * cin, wc * cout).astype(compute_dtype)


def _vmem_limit_bytes(per_step_bytes):
    """Scoped-VMEM request: capacity-aware, never below the estimated footprint."""
    try:
        cap = int(pltpu.get_tpu_info().vmem_capacity_bytes)
    except Exception:
        cap = 64 * 2 ** 20            # assume the smallest per-core VMEM (v7x) if query fails
    max_ask = cap - 12 * 2 ** 20      # headroom for Mosaic internal scratch
    want = int(1.5 * per_step_bytes) + (2 << 20)
    if want <= 12 * 2 ** 20:          # comfortably inside every generation's default scoped limit
        return None
    # TODO(synk): if per_step_bytes itself exceeds max_ask, an output-row grid axis is needed.
    return min(want, max_ask)


def basic_conv2d_nhwc(x_nhwc, w_oihw, bias, gamma, beta, running_mean, running_var,
                      *, pool=True, padding=1, eps=1e-3,
                      compute_dtype=jnp.bfloat16, out_dtype=None, max_batch_block=8):
    """NHWC-native forward (preferred: keeps activations NHWC across layers)."""
    n, h, w, cin = x_nhwc.shape
    cout, cin_w, kh, kw = w_oihw.shape
    assert cin_w == cin, (cin_w, cin)
    hp = h + 2 * padding
    wp = w + 2 * padding
    hc, wc = hp - kh + 1, wp - kw + 1                        # conv output size (stride 1)
    ho, wo = (hc // 2, wc // 2) if pool else (hc, wc)
    out_dtype = x_nhwc.dtype if out_dtype is None else out_dtype
    cb = jnp.dtype(compute_dtype).itemsize
    ob = jnp.dtype(out_dtype).itemsize

    # Batch blocking: keep the (parallel) grid length >= 2 when possible; pad awkward batches.
    bblk = max(1, min(max_batch_block, n // 2)) if n >= 2 else 1
    n_pad = -(-n // bblk) * bblk
    x = x_nhwc.astype(compute_dtype).reshape(n, h, w * cin)  # lane-dense (W,C merged) view
    if n_pad != n:
        x = jnp.concatenate([x, jnp.zeros((n_pad - n, h, w * cin), compute_dtype)], axis=0)

    scale = gamma / jnp.sqrt(running_var + eps)
    shift = beta - running_mean * scale
    bss = jnp.stack([bias, scale, shift]).astype(jnp.float32)          # (3, cout)

    band_bytes = kh * w * cin * wc * cout * cb
    grouped = (wc * cout <= 1024) and (band_bytes <= 6 * 2 ** 20)

    if grouped:
        w_band = _band_weights(w_oihw, wc=wc, w=w, pad=padding, pool=pool,
                               compute_dtype=compute_dtype)            # (kh, w*cin, wc*cout)
        out_pix = wo if pool else wc
        bss_t = jnp.tile(bss, (1, out_pix))                            # (3, out_pix*cout)
        kernel = functools.partial(
            _grouped_kernel, bblk=bblk, h=h, w=w, cin=cin, cout=cout, kh=kh,
            pad=padding, pool=pool, hc=hc, wc=wc, ho=ho, wo=wo, hp=hp)
        in_specs = [
            pl.BlockSpec((bblk, h, w * cin), lambda b: (b, 0, 0)),
            pl.BlockSpec((kh, w * cin, wc * cout), lambda b: (0, 0, 0)),
            pl.BlockSpec((3, out_pix * cout), lambda b: (0, 0)),
        ]
        scratch_shapes = [pltpu.VMEM((bblk, hp, w * cin), compute_dtype)]
        args = (x, w_band, bss_t)
        per_step = (2 * bblk * h * w * cin * cb          # input block (double-buffered)
                    + 2 * kh * w * cin * wc * cout * cb  # band weights (double-buffered)
                    + 2 * bblk * ho * wo * cout * ob     # output block (double-buffered)
                    + bblk * hp * w * cin * cb           # padded-row scratch
                    + bblk * hc * w * cin * cb           # one row-band slice temp
                    + 4 * bblk * hc * wc * cout * 4)     # f32 acc + pool/tail temps
    else:
        # TODO(synk): column-block (g < wc) band grouping for large wc*cout layers.
        w_k = jnp.transpose(w_oihw, (2, 3, 1, 0)).reshape(kh * kw * cin, cout)
        w_k = w_k.astype(compute_dtype)
        kernel = functools.partial(
            _im2col_kernel, bblk=bblk, h=h, w=w, cin=cin, cout=cout, kh=kh, kw=kw,
            pad=padding, pool=pool, hc=hc, wc=wc, ho=ho, wo=wo)
        in_specs = [
            pl.BlockSpec((bblk, h, w * cin), lambda b: (b, 0, 0)),
            pl.BlockSpec((kh * kw * cin, cout), lambda b: (0, 0)),
            pl.BlockSpec((3, cout), lambda b: (0, 0)),
        ]
        scratch_shapes = []
        args = (x, w_k, bss)
        per_step = (2 * bblk * h * w * cin * cb
                    + 2 * kh * kw * cin * cout * cb
                    + 2 * bblk * ho * wo * cout * ob
                    + 2 * bblk * hp * wp * cin * cb              # padded copy + concat relayouts
                    + 2 * bblk * hc * wc * kh * kw * cin * cb    # im2col patch + concat temps
                    + 3 * bblk * hc * wc * cout * 4)

    out = pl.pallas_call(
        kernel,
        out_shape=jax.ShapeDtypeStruct((n_pad, ho, wo * cout), out_dtype),
        grid_spec=pltpu.PrefetchScalarGridSpec(
            num_scalar_prefetch=0,
            grid=(n_pad // bblk,),
            in_specs=in_specs,
            out_specs=pl.BlockSpec((bblk, ho, wo * cout), lambda b: (b, 0, 0)),
            scratch_shapes=scratch_shapes,
        ),
        compiler_params=pltpu.CompilerParams(
            dimension_semantics=("parallel",),
            vmem_limit_bytes=_vmem_limit_bytes(per_step)),
    )(*args)

    return out[:n].reshape(n, ho, wo, cout)


def basic_conv2d(x_nchw, w_oihw, bias, gamma, beta, running_mean, running_var, **kwargs):
    """NCHW compatibility wrapper (PyTorch interface parity). Prefer basic_conv2d_nhwc when
    chaining layers: the two transposes below are pure HBM round trips."""
    x = jnp.transpose(x_nchw, (0, 2, 3, 1))                           # NCHW -> NHWC
    out = basic_conv2d_nhwc(x, w_oihw, bias, gamma, beta, running_mean, running_var, **kwargs)
    return jnp.transpose(out, (0, 3, 1, 2))                           # NHWC -> NCHW


if __name__ == "__main__":
    key = jax.random.PRNGKey(0)
    kx, k1, k2, k3, k4, k5, k6 = jax.random.split(key, 7)

    # Small shapes consistent with the module: Conv2d(4 -> 8, kernel_size=3, padding=1), pool=True.
    N, CIN, H, W = 2, 4, 16, 16
    COUT, KH, KW, PAD = 8, 3, 3, 1
    POOL = True
    EPS = 1e-3

    x = jax.random.normal(kx, (N, CIN, H, W), jnp.float32)
    w = jax.random.normal(k1, (COUT, CIN, KH, KW), jnp.float32) * 0.1
    b = jax.random.normal(k2, (COUT,), jnp.float32) * 0.1
    gamma = jax.random.uniform(k3, (COUT,), jnp.float32, minval=0.5, maxval=1.5)
    beta = jax.random.normal(k4, (COUT,), jnp.float32) * 0.1
    rmean = jax.random.normal(k5, (COUT,), jnp.float32) * 0.1
    rvar = jax.random.uniform(k6, (COUT,), jnp.float32, minval=0.5, maxval=1.5)

    out = basic_conv2d(x, w, b, gamma, beta, rmean, rvar, pool=POOL, padding=PAD, eps=EPS)
    out = jax.block_until_ready(out)

    # Pure-JAX reference with identical (inference) semantics; operands cast to bf16 like the
    # kernel's MXU path, accumulation in f32, module op order (bias before pool).
    conv = jax.lax.conv_general_dilated(
        x.astype(jnp.bfloat16), w.astype(jnp.bfloat16),
        window_strides=(1, 1), padding=((PAD, PAD), (PAD, PAD)),
        dimension_numbers=("NCHW", "OIHW", "NCHW"),
        preferred_element_type=jnp.float32)
    conv = conv + b[None, :, None, None]
    if POOL:
        conv = jax.lax.reduce_window(conv, -jnp.inf, jax.lax.max,
                                     (1, 1, 2, 2), (1, 1, 2, 2), "VALID")
    act = jnp.maximum(conv, 0.0)
    scale = gamma / jnp.sqrt(rvar + EPS)
    shift = beta - rmean * scale
    ref = act * scale[None, :, None, None] + shift[None, :, None, None]

    assert out.shape == ref.shape, (out.shape, ref.shape)
    max_err = float(jnp.max(jnp.abs(out - ref)))
    assert jnp.allclose(out, ref, atol=2e-3, rtol=2e-3), f"max abs err = {max_err}"
    print("KERNEL_OK")
</pallas_src>

<mosaic_0001>
module attributes {stable_mosaic.version = 11 : i64} {
  func.func @_grouped_kernel(%arg0: i32, %arg1: memref<1x16x64xbf16, #tpu.memory_space<vmem>>, %arg2: memref<3x64x128xbf16, #tpu.memory_space<vmem>>, %arg3: memref<3x64xf32, #tpu.memory_space<vmem>>, %arg4: memref<1x8x64xf32, #tpu.memory_space<vmem>>, %arg5: memref<1x18x64xbf16, #tpu.memory_space<vmem>>) attributes {dimension_semantics = [#tpu.dimension_semantics<parallel>], iteration_bounds = array<i64: 2>, scalar_prefetch = 0 : i64, scratch_operands = 1 : i64, tpu.core_type = #tpu.core_type<tc>, window_params = [{transform_indices = @transform_0, window_bounds = array<i64: 1, 16, 64>}, {pipeline_mode = #tpu.pipeline_mode<synchronous>, transform_indices = @transform_1, window_bounds = array<i64: 3, 64, 128>}, {pipeline_mode = #tpu.pipeline_mode<synchronous>, transform_indices = @transform_2, window_bounds = array<i64: 3, 64>}, {transform_indices = @transform_3, window_bounds = array<i64: 1, 8, 64>}]} {
    %cst = arith.constant 0.000000e+00 : bf16
    %0 = vector.broadcast %cst : bf16 to vector<1x18x64xbf16>
    %c0 = arith.constant 0 : index
    %c0_0 = arith.constant 0 : index
    %c0_1 = arith.constant 0 : index
    %1 = vector.load %arg5[%c0, %c0_0, %c0_1] : memref<1x18x64xbf16, #tpu.memory_space<vmem>>, vector<1x18x64xbf16>
    tpu.vector_store %arg5[%c0, %c0_0, %c0_1], %0 {strides = array<i32>} : memref<1x18x64xbf16, #tpu.memory_space<vmem>>, vector<1x18x64xbf16>,
    %c0_2 = arith.constant 0 : index
    %c0_3 = arith.constant 0 : index
    %c0_4 = arith.constant 0 : index
    %2 = vector.load %arg1[%c0_2, %c0_3, %c0_4] : memref<1x16x64xbf16, #tpu.memory_space<vmem>>, vector<1x16x64xbf16>
    %c0_5 = arith.constant 0 : index
    %c1 = arith.constant 1 : index
    %c0_6 = arith.constant 0 : index
    %3 = vector.load %arg5[%c0_5, %c1, %c0_6] : memref<1x18x64xbf16, #tpu.memory_space<vmem>>, vector<1x16x64xbf16>
    tpu.vector_store %arg5[%c0_5, %c1, %c0_6], %2 {strides = array<i32>} : memref<1x18x64xbf16, #tpu.memory_space<vmem>>, vector<1x16x64xbf16>,
    %c0_7 = arith.constant 0 : index
    %c0_8 = arith.constant 0 : index
    %c0_9 = arith.constant 0 : index
    %4 = vector.load %arg5[%c0_7, %c0_8, %c0_9] : memref<1x18x64xbf16, #tpu.memory_space<vmem>>, vector<1x16x64xbf16>
    %5 = vector.shape_cast %4 : vector<1x16x64xbf16> to vector<16x64xbf16>
    %c0_10 = arith.constant 0 : index
    %c0_11 = arith.constant 0 : index
    %c0_12 = arith.constant 0 : index
    %6 = vector.load %arg2[%c0_10, %c0_11, %c0_12] : memref<3x64x128xbf16, #tpu.memory_space<vmem>>, vector<1x64x128xbf16>
    %7 = vector.shape_cast %6 : vector<1x64x128xbf16> to vector<64x128xbf16>
    %cst_13 = arith.constant dense<0.000000e+00> : vector<16x128xf32>
    %8 = tpu.matmul %5, %7, %cst_13 {dimension_numbers = #tpu.dot_dimension_numbers<[1], [0], [0], [1], [0, 0, 1, 1], [], []>} : vector<16x64xbf16>, vector<64x128xbf16>, vector<16x128xf32> -> vector<16x128xf32>
    %c0_14 = arith.constant 0 : index
    %c1_15 = arith.constant 1 : index
    %c0_16 = arith.constant 0 : index
    %9 = vector.load %arg5[%c0_14, %c1_15, %c0_16] : memref<1x18x64xbf16, #tpu.memory_space<vmem>>, vector<1x16x64xbf16>
    %10 = vector.shape_cast %9 : vector<1x16x64xbf16> to vector<16x64xbf16>
    %c1_17 = arith.constant 1 : index
    %c0_18 = arith.constant 0 : index
    %c0_19 = arith.constant 0 : index
    %11 = vector.load %arg2[%c1_17, %c0_18, %c0_19] : memref<3x64x128xbf16, #tpu.memory_space<vmem>>, vector<1x64x128xbf16>
    %12 = vector.shape_cast %11 : vector<1x64x128xbf16> to vector<64x128xbf16>
    %cst_20 = arith.constant dense<0.000000e+00> : vector<16x128xf32>
    %13 = tpu.matmul %10, %12, %cst_20 {dimension_numbers = #tpu.dot_dimension_numbers<[1], [0], [0], [1], [0, 0, 1, 1], [], []>} : vector<16x64xbf16>, vector<64x128xbf16>, vector<16x128xf32> -> vector<16x128xf32>
    %14 = arith.addf %8, %13 : vector<16x128xf32>
    %c0_21 = arith.constant 0 : index
    %c2 = arith.constant 2 : index
    %c0_22 = arith.constant 0 : index
    %15 = vector.load %arg5[%c0_21, %c2, %c0_22] : memref<1x18x64xbf16, #tpu.memory_space<vmem>>, vector<1x16x64xbf16>
    %16 = vector.shape_cast %15 : vector<1x16x64xbf16> to vector<16x64xbf16>
    %c2_23 = arith.constant 2 : index
    %c0_24 = arith.constant 0 : index
    %c0_25 = arith.constant 0 : index
    %17 = vector.load %arg2[%c2_23, %c0_24, %c0_25] : memref<3x64x128xbf16, #tpu.memory_space<vmem>>, vector<1x64x128xbf16>
    %18 = vector.shape_cast %17 : vector<1x64x128xbf16> to vector<64x128xbf16>
    %cst_26 = arith.constant dense<0.000000e+00> : vector<16x128xf32>
    %19 = tpu.matmul %16, %18, %cst_26 {dimension_numbers = #tpu.dot_dimension_numbers<[1], [0], [0], [1], [0, 0, 1, 1], [], []>} : vector<16x64xbf16>, vector<64x128xbf16>, vector<16x128xf32> -> vector<16x128xf32>
    %20 = arith.addf %14, %19 : vector<16x128xf32>
    %21 = vector.shape_cast %20 : vector<16x128xf32> to vector<1x16x128xf32>
    %22 = vector.extract_strided_slice %21 {offsets = [0, 0, 0], sizes = [1, 16, 64], strides = [1, 1, 1]} : vector<1x16x128xf32> to vector<1x16x64xf32>
    %23 = vector.extract_strided_slice %21 {offsets = [0, 0, 64], sizes = [1, 16, 64], strides = [1, 1, 1]} : vector<1x16x128xf32> to vector<1x16x64xf32>
    %24 = arith.maximumf %22, %23 : vector<1x16x64xf32>
    %25 = vector.shape_cast %24 : vector<1x16x64xf32> to vector<1x8x2x64xf32>
    %26 = vector.extract_strided_slice %25 {offsets = [0, 0, 0, 0], sizes = [1, 8, 1, 64], strides = [1, 1, 1, 1]} : vector<1x8x2x64xf32> to vector<1x8x1x64xf32>
    %27 = vector.shape_cast %26 : vector<1x8x1x64xf32> to vector<1x8x64xf32>
    %28 = vector.extract_strided_slice %25 {offsets = [0, 0, 1, 0], sizes = [1, 8, 1, 64], strides = [1, 1, 1, 1]} : vector<1x8x2x64xf32> to vector<1x8x1x64xf32>
    %29 = vector.shape_cast %28 : vector<1x8x1x64xf32> to vector<1x8x64xf32>
    %30 = arith.maximumf %27, %29 : vector<1x8x64xf32>
    %c0_27 = arith.constant 0 : index
    %c0_28 = arith.constant 0 : index
    %31 = vector.load %arg3[%c0_27, %c0_28] : memref<3x64xf32, #tpu.memory_space<vmem>>, vector<1x64xf32>
    %32 = vector.shape_cast %31 : vector<1x64xf32> to vector<64xf32>
    %c1_29 = arith.constant 1 : index
    %c0_30 = arith.constant 0 : index
    %33 = vector.load %arg3[%c1_29, %c0_30] : memref<3x64xf32, #tpu.memory_space<vmem>>, vector<1x64xf32>
    %34 = vector.shape_cast %33 : vector<1x64xf32> to vector<64xf32>
    %c2_31 = arith.constant 2 : index
    %c0_32 = arith.constant 0 : index
    %35 = vector.load %arg3[%c2_31, %c0_32] : memref<3x64xf32, #tpu.memory_space<vmem>>, vector<1x64xf32>
    %36 = vector.shape_cast %35 : vector<1x64xf32> to vector<64xf32>
    %37 = vector.shape_cast %32 : vector<64xf32> to vector<1x1x64xf32>
    %38 = vector.broadcast %37 : vector<1x1x64xf32> to vector<1x8x64xf32>
    %39 = arith.addf %30, %38 : vector<1x8x64xf32>
    %cst_33 = arith.constant 0.000000e+00 : f32
    %40 = vector.broadcast %cst_33 : f32 to vector<1x8x64xf32>
    %41 = arith.maximumf %39, %40 : vector<1x8x64xf32>
    %42 = vector.shape_cast %34 : vector<64xf32> to vector<1x1x64xf32>
    %43 = vector.broadcast %42 : vector<1x1x64xf32> to vector<1x8x64xf32>
    %44 = arith.mulf %41, %43 : vector<1x8x64xf32>
    %45 = vector.shape_cast %36 : vector<64xf32> to vector<1x1x64xf32>
    %46 = vector.broadcast %45 : vector<1x1x64xf32> to vector<1x8x64xf32>
    %47 = arith.addf %44, %46 : vector<1x8x64xf32>
    %c0_34 = arith.constant 0 : index
    %c0_35 = arith.constant 0 : index
    %c0_36 = arith.constant 0 : index
    %48 = vector.load %arg4[%c0_34, %c0_35, %c0_36] : memref<1x8x64xf32, #tpu.memory_space<vmem>>, vector<1x8x64xf32>
    tpu.vector_store %arg4[%c0_34, %c0_35, %c0_36], %47 {strides = array<i32>} : memref<1x8x64xf32, #tpu.memory_space<vmem>>, vector<1x8x64xf32>,
    return
  }
  func.func @transform_0(%arg0: i32) -> (i32, i32, i32) {
    %c0_i32 = arith.constant 0 : i32
    %c0_i32_0 = arith.constant 0 : i32
    %c0_i32_1 = arith.constant 0 : i32
    return %arg0, %c0_i32, %c0_i32_0 : i32, i32, i32
  }
  func.func @transform_1(%arg0: i32) -> (i32, i32, i32) {
    %c0_i32 = arith.constant 0 : i32
    %c0_i32_0 = arith.constant 0 : i32
    %c0_i32_1 = arith.constant 0 : i32
    %c0_i32_2 = arith.constant 0 : i32
    return %c0_i32, %c0_i32_0, %c0_i32_1 : i32, i32, i32
  }
  func.func @transform_2(%arg0: i32) -> (i32, i32) {
    %c0_i32 = arith.constant 0 : i32
    %c0_i32_0 = arith.constant 0 : i32
    %c0_i32_1 = arith.constant 0 : i32
    return %c0_i32, %c0_i32_0 : i32, i32
  }
  func.func @transform_3(%arg0: i32) -> (i32, i32, i32) {
    %c0_i32 = arith.constant 0 : i32
    %c0_i32_0 = arith.constant 0 : i32
    %c0_i32_1 = arith.constant 0 : i32
    return %arg0, %c0_i32, %c0_i32_0 : i32, i32, i32
  }
}

</mosaic_0001>

<bundles_post_ra>
// kernel: tpu_custom_call.1
= control target key start
LH: loop header
LB: loop body
LE: loop exit
PB: predicated region body
PF: predicated region fallthrough
CT: control target
= control target key end

     0   :  { %8 = vsyncpa [#allocation4], 0  ;;  %s1282_s0 = inlined_call_operand.hbm [shape: bf16[2,16,64], index: 0, kind: input, shape index: {}]   ;;  %s1283_s1 = inlined_call_operand.hbm [shape: bf16[3,64,128], index: 1, kind: input, shape index: {}]   ;;  %s1284_s2 = inlined_call_operand.hbm [shape: f32[3,64], index: 2, kind: input, shape index: {}]   ;;  %s1285_s3 = inlined_call_operand.hbm [shape: f32[2,8,64], index: 3, kind: output, shape index: {}]  }
   0x1   :  { %10 = vsyncpa [#allocation4 + $0x1], 0 }
   0x2   :  { %11 = vsyncpa [#allocation7], 0 }
   0x3   :  { %12 = vsyncpa [#allocation5], 0 }
   0x4   :  { %14 = vsyncpa [#allocation5 + $0x1], 0  ;;  %s1085_s12 = smov 0   ;;  %s1087_s13 = smov 0  }
   0x5   :  { %s1089_s14 = smov 0   ;;  %s1091_s15 = smov 0  }
   0x6 LB: > { %s1106_s16 = sadd.s32 4294967295, %s1057_s15   ;;  %s727_s17 = sadd.s32 4294967294, %s1057_s15   ;;  %s1057_s15 = sphi %s1091_s15, %s1299_s15   ;;  %s1053_s14 = sphi %s1089_s14, %s1298_s14   ;;  %s1049_s13 = sphi %s1087_s13, %s1297_s13   ;;  %s1045_s12 = sphi %s1085_s12, %s1296_s12  }
   0x7   : > { %p40_p0 = scmp.ne.s32.totalorder %s1049_s13, %s1045_s12  ;;  %p41_p1 = scmp.eq.s32.totalorder %s1106_s16, 0 }
   0x8   : > { %p106_p2 = scmp.eq.s32.totalorder %s1106_s16, 1  ;;  %p112_p3 = scmp.eq.s32.totalorder %s727_s17, 1 }
   0x9   : > { %p1115_p4 = por %p41_p1, %p40_p0  ;;  %p728_p5 = scmp.ge.s32.totalorder %s1057_s15, 1 }
   0xa   : > { %p1120_p6 = por %p112_p3, %p40_p0  ;;  %p119_p7 = scmp.lt.s32.totalorder %s1057_s15, 3 }
   0xb   : > { %s130_s22 = sshll.u32 %s1283_s1, 4  ;;  %s1059_s24 = smov [#allocation6]   ;;  %s131_s22 = int_to_ptr.hbm [resolvable:$true] %s130_s22 }
   0xc   : > { %p1128_p8 = pnand %p728_p5, %p119_p7  ;;  %s132_s25 = sshll.u32 %s1059_s24, 4  ;;  %s133_s25 = int_to_ptr.vmem [resolvable:$true] %s132_s25 }
   0xd   : > { %s145_s28 = sshll.u32 %s1284_s2, 4  ;;  %s1060_s29 = smov 64   ;;  %s146_s28 = int_to_ptr.hbm [resolvable:$true] %s145_s28 }
   0xe   : > { %p835_p9 = pneg %p1128_p8  ;;  %s1061_s30 = smov 4  }
   0xf   : > { %s1062_s4 = smov [#allocation8]   ;;  %s1144_s6 = sadd.s32 1, %s1057_s15  }
  0x10   : > { %p836_p10 = pnand %p835_p9, %p41_p1  ;;  %s147_s5 = sshll.u32 %s1062_s4, 4  ;;  %s148_s5 = int_to_ptr.vmem [resolvable:$true] %s147_s5 }
  0x11   : > { %s27_s7 = sadd.s32 1, %s1053_s14  ;;  %s24_s8 = ssub.s32 %s1057_s15, %s1144_s6 }
  0x12   : > { %838 = dma.hbm_to_vmem [thread:$0]  (!%p836_p10), %s131_s22, 1536, %s133_s25, [#allocation7], %s1060_s29, %s1060_s29, %s1061_s30  }
  0x13   : > { %841 = dma.hbm_to_vmem [thread:$0]  (!%p836_p10), %s146_s28, 64, %s148_s5, [#allocation7]  }
  0x14   : > { %p34_p12 = scmp.ne.s32.totalorder %s1053_s14, %s1049_s13  ;;  %p25_p13 = scmp.eq.s32.totalorder %s24_s8, 0 }
  0x15   : > { %p35_p0 = scmp.eq.s32.totalorder %s1057_s15, 0  ;;  %p852_p5 = scmp.lt.s32.totalorder %s1057_s15, 2 }
  0x16   : > { %p1154_p3 = por %p106_p2, %p34_p12  ;;  %s158_s11 = sand.u32 1, %s1053_s14  }
  0x17   : > { %s1160_s10 = scalar_select %p25_p13, %s1053_s14, %s27_s7  }
  0x18   : > { %p36_p7 = por %p35_p0, %p34_p12  ;;  %s732_s17 = sshll.u32 %s158_s11, 3 }
  0x19   : > { %s803_s20 = sshll.u32 %s1057_s15, 3  ;;  %s162_s25 = scalar_lea.vmem [#allocation3], %s732_s17 }
  0x1a   : > { %s167_s24 = scalar_lea.hbm %s1282_s0, %s803_s20  ;;  %s170_s26 = sshll.u32 %s162_s25, 4  ;;  %s171_s26 = int_to_ptr.vmem [resolvable:$true] %s170_s26 }
  0x1b   : > { %s168_s27 = sshll.u32 %s167_s24, 4  ;;  %p1167_p2 = pnand %p852_p5, %p36_p7  ;;  %s169_s27 = int_to_ptr.hbm [resolvable:$true] %s168_s27 }
  0x1c   : > { %s159_s4 = scalar_lea.sflag [#allocation4], %s158_s11  ;;  %s957_s5 = sshra.s32 %s169_s27, 4  ;;  %s958_s5 = int_to_ptr.hbm [resolvable:$true] %s957_s5 }
  0x1d   : > { %s959_s7 = scalar_lea.hbm %s958_s5, 8  ;;  %p961_p10 = pneg %p1167_p2 }
  0x1e   : > { %p960_p9 = scmp.ne.s32.totalorder %s958_s5, %s959_s7  ;;  %s964_s20 = scalar_lea.hbm %s1282_s0, 16 }
  0x1f   : > { %p965_p0 = scmp.lt.s32.totalorder %s958_s5, %s1282_s0  ;;  %p966_p5 = scmp.lt.s32.totalorder %s964_s20, %s959_s7 }
  0x20   : > { %p962_p12 = pnand %p961_p10, %p960_p9 }
  0x21   : > { %p967_p7 = por %p966_p5, %p965_p0 }
  0x22   : > { %p963_p13 = pneg %p962_p12 }
  0x24   : > { %p968_p11 = pnand %p967_p7, %p963_p13 }
  0x26   : > { %971 = shalt.err (!%p968_p11)
}
  0x27   : > { %845 = dma.hbm_to_vmem [thread:$0]  (!%p1167_p2), %s169_s27, 128, %s171_s26, %s159_s4, %s1060_s29, %s1060_s29, %s1061_s30  }
  0x28   : > { %182 = sbr.rel (%p1128_p8) target bundleno = 359 (0x167), region = 32  ;;  %s1187_s11 = sand.u32 (!%p1128_p8), 1, %s1049_s13  }
  0x29   : > { %s736_s24 = sshll.u32 (!%p1128_p8), %s1187_s11, 3  ;;  %s185_s25 = scalar_lea.sflag (!%p1128_p8), [#allocation4], %s1187_s11 }
  0x2a   : > { %s188_s5 = scalar_lea.vmem (!%p1128_p8), [#allocation3], %s736_s24 }
  0x2d   : > { %1032 = dma.done.wait (%p1115_p4), %s185_s25, 128  }
  0x2e   : > { %1034 = vsyncadd (%p1115_p4), %s185_s25, 4294967168 }
  0x2f   : > { %1036 = dma.done.wait (%p41_p1), [#allocation7], 1600  }
  0x30   : > { %1038 = vsyncadd (%p41_p1), [#allocation7], 4294965696  ;;  %vm223_vm0 = vcmask 519168   ;;  %vm226_vm1 = vcmask 516096   ;;  %v1063_v0 = vmov 0   ;;  %v807_v1 = vld [vmem:[#allocation6 + $0x18] sm:$0xff] }
  0x31   : > { %224 = vst.msk [vmem:[#allocation2] sm:$0xf] %vm223_vm0, %v1063_v0  ;;  %vm231_vm2 = vsmask.f32 4368  ;;  %v815_v2 = vld [vmem:[#allocation6 + $0x58] sm:$0xff]  ;;  %378 = vmatpush.bf16.msra.mxu1 %v807_v1  ;;  %v806_v4 = vld [vmem:[#allocation6 + $0x10] sm:$0xff] }
  0x32   : > { %225 = vst.msk [vmem:[#allocation2 + $0x4] sm:$0xf] %vm223_vm0, %v1063_v0  ;;  %v811_v3 = vld [vmem:[#allocation6 + $0x38] sm:$0xff]  ;;  %vm230_vm3 = vsmask.f32 256  ;;  %436 = vmatpush.bf16.msra.mxu2 %v815_v2  ;;  %v814_v5 = vld [vmem:[#allocation6 + $0x50] sm:$0xff] }
  0x33   : > { %227 = vst.msk [vmem:[#allocation2 + $0x8] sm:$0x1] %vm226_vm1, %v1063_v0  ;;  %vm254_vm4 = vsmask.f32 7938  ;;  %vm1205_vm5 = vmor %vm230_vm3, %vm231_vm2  ;;  %338 = vmatpush.bf16.msra.mxu0 %v811_v3  ;;  %v810_v7 = vld [vmem:[#allocation6 + $0x30] sm:$0xff]  ;;  %v805_v15 = vld [vmem:[#allocation6 + $0x8] sm:$0xff] }
  0x34   : > { %v228_v8 = vld [vmem:[%s188_s5] sm:$0xf]  ;;  %v229_v9 = vld [vmem:[%s188_s5 + $0x4] sm:$0xf]  ;;  %vm1210_vm6 = vmand %vm223_vm0, %vm254_vm4  ;;  %vm330_vm8 = vcmask 523264   ;;  %vm401_vm9 = vcmask 1046528  }
  0x35   : > { %v234_v10 = vshrl.u32 %v228_v8, 16  ;;  %v237_v11 = vshll.u32 %v228_v8, 16  ;;  %v242_v12 = vshrl.u32 %v229_v9, 16  ;;  %v245_v13 = vshll.u32 %v229_v9, 16  ;;  %v813_v16 = vld [vmem:[#allocation6 + $0x48] sm:$0xff]  ;;  %379 = vmatpush.bf16.msra.mxu1 %v806_v4  ;;  %vm261_vm7 = vmand %vm226_vm1, %vm230_vm3  ;;  %v804_v26 = vld [vmem:[#allocation6] sm:$0xff] }
  0x36   : > { %v809_v17 = vld [vmem:[#allocation6 + $0x28] sm:$0xff]  ;;  %437 = vmatpush.bf16.msra.mxu2 %v814_v5  ;;  %v812_v30 = vld [vmem:[#allocation6 + $0x40] sm:$0xff]  ;;  %vm293_vm10 = vsmask.f32 7424  ;;  %s1064_s18 = smov 64   ;;  %vm606_vm11 = vcmask 1041409  }
  0x37   : > { %v236_v18 = vrot.slane %v234_v10, 7  ;;  %v244_v19 = vrot.slane %v242_v12, 7  ;;  %339 = vmatpush.bf16.msra.mxu0 %v810_v7  ;;  %v808_v31 = vld [vmem:[#allocation6 + $0x20] sm:$0xff]  ;;  %vm608_vm12 = vcmask 1042434   ;;  %s800_s23 = sshll.u32 %s1106_s16, 3  ;;  %vm610_vm13 = vcmask 1043459  }
  0x38   : > { %v256_v20 = vld [vmem:[#allocation2] sm:$0xf]  ;;  %v1224_v59 = vld [vmem:[#allocation8] ss:$0 sm:$0xff]  ;;  %v1226_v60 = vld [vmem:[#allocation8 + $0x1] ss:$0 sm:$0xff]  ;;  %s633_s26 = scalar_lea.hbm %s1285_s3, %s800_s23 }
  0x39   : > { %v239_v22 = vor.u32 %v237_v11, %v236_v18  ;;  %v240_v23 = vrot.slane %v236_v18, 4  ;;  %v247_v24 = vor.u32 %v245_v13, %v244_v19  ;;  %v249_v25 = vrot.slane %v244_v19, 4  ;;  %380 = vmatpush.bf16.msra.mxu1 %v805_v15  ;;  %v1229_v62 = vld [vmem:[#allocation8 + $0x2] ss:$0 sm:$0xff]  ;;  %s221_s16 = scalar_lea.vmem [#allocation9], %s736_s24  ;;  %s637_s28 = sshll.u32 %s633_s26, 4  ;;  %s638_s28 = int_to_ptr.hbm [resolvable:$true] %s637_s28 }
  0x3a   : > { %v262_v21 = vld [vmem:[#allocation2 + $0x8] sm:$0x1]  ;;  %438 = vmatpush.bf16.msra.mxu2 %v813_v16  ;;  %v509_v61 = vrot.slane %v1224_v59, 2  ;;  %v512_v1 = vrot.slane %v1224_v59, 1  ;;  %v542_v2 = vrot.slane %v1226_v60, 2  ;;  %v567_v8 = vrot.slane %v1229_v62, 2 }
  0x3b   : > { %v248_v27 = vsel %vm1205_vm5, %v240_v23, %v247_v24  ;;  %v257_v28 = vsel %vm1210_vm6, %v239_v22, %v256_v20  ;;  %v263_v29 = vsel %vm261_vm7, %v249_v25, %v262_v21  ;;  %340 = vmatpush.bf16.msra.mxu0 %v809_v17  ;;  %v510_v9 = vrot.slane %v1224_v59, 4  ;;  %s635_s27 = sshll.u32 %s221_s16, 4  ;;  %s623_s4 = scalar_lea.sflag [#allocation5], %s1187_s11  ;;  %s636_s27 = int_to_ptr.vmem [resolvable:$true] %s635_s27 }
  0x3c   : > { %258 = vst [vmem:[#allocation2] sm:$0xf] %v257_v28  ;;  %v513_v7 = vrot.slane %v509_v61, 1  ;;  %v511_v10 = vrot.slane %v1224_v59, 6  ;;  %v545_v15 = vrot.slane %v1226_v60, 1  ;;  %v546_v16 = vrot.slane %v542_v2, 1 }
  0x3d   : > { %259 = vst.msk [vmem:[#allocation2 + $0x4] sm:$0xf] %vm223_vm0, %v248_v27  ;;  %381 = vmatpush.bf16.msra.mxu1 %v804_v26  ;;  %v570_v17 = vrot.slane %v1229_v62, 1  ;;  %v543_v18 = vrot.slane %v1226_v60, 4  ;;  %v571_v23 = vrot.slane %v567_v8, 1  ;;  %v514_v24 = vrot.slane %v510_v9, 1 }
  0x3e   : > { %264 = vst [vmem:[#allocation2 + $0x8] sm:$0x1] %v263_v29  ;;  %439 = vmatpush.bf16.msra.mxu2 %v812_v30  ;;  %v515_v25 = vrot.slane %v511_v10, 1  ;;  %v544_v27 = vrot.slane %v1226_v60, 6  ;;  %vm612_vm14 = vcmask 1044484   ;;  %vm614_vm15 = vcmask 1045509  }
  0x3f   : > { %341 = vmatpush.bf16.msra.mxu0 %v808_v31  ;;  %vm616_vm0 = vcmask 1046534   ;;  %vm618_vm1 = vcmask 1047559   ;;  %s1001_s7 = sshra.s32 %s638_s28, 4  ;;  %s1007_s21 = scalar_lea.hbm %s1285_s3, 16  ;;  %s1002_s7 = int_to_ptr.hbm [resolvable:$true] %s1001_s7 }
  0x40   : > { %s1003_s8 = scalar_lea.hbm %s1002_s7, 8  ;;  %p1008_p11 = scmp.lt.s32.totalorder %s1002_s7, %s1285_s3 }
  0x41   : > { %p1004_p1 = scmp.ne.s32.totalorder %s1002_s7, %s1003_s8  ;;  %p1009_p2 = scmp.lt.s32.totalorder %s1007_s21, %s1003_s8 }
  0x43   : > { %v821_v32 = vld [vmem:[#allocation2] sm:$0xe]  ;;  %p1005_p4 = pnand %p1004_p1, %p1154_p3  ;;  %p1010_p9 = por %p1009_p2, %p1008_p11 }
  0x44   : > { %v817_v33 = vld [vmem:[#allocation2] sm:$0xff]  }
  0x45   : > { %v820_v34 = vld [vmem:[#allocation2] sm:$0xf0]  ;;  %v297_v35 = vshll.u32 %v817_v33, 16  ;;  %773 = vmatmul.msk.bf16.vlgmr.msra.gmra.mxu1 %vm330_vm8, %v817_v33  ;;  %v275_v36 = vld [vmem:[#allocation2 + $0x8] sm:$0x1]  ;;  %v295_v38 = vshrl.u32 %v817_v33, 16  ;;  %p1006_p8 = pneg %p1005_p4 }
  0x46   : > { %v822_v37 = vor.u32 %v821_v32, %v820_v34  ;;  %v290_v39 = vunpack.c.l.b16 %v275_v36  ;;  %v547_v32 = vrot.slane %v543_v18, 1  ;;  %v568_v33 = vrot.slane %v1229_v62, 4 }
  0x47   : > { %v299_v40 = vrot.slane %v297_v35, 1  ;;  %p1011_p10 = pnand %p1010_p9, %p1006_p8 }
  0x48   : > { %v292_v41 = vpack.c.b16 %v290_v39, %v290_v39  ;;  %v402_v42 = vrot.slane %v822_v37, 1 }
  0x49   : > { %v300_v43 = vor.u32 %v299_v40, %v295_v38 }
  0x4a   : > { %v403_v44 = vrot.slane %v292_v41, 1  ;;  %v302_v45 = vshll.u32 %v292_v41, 16 }
  0x4c   : > { %v404_v46 = vsel %vm401_vm9, %v402_v42, %v403_v44  ;;  %v304_v47 = vrot.slane %v302_v45, 1 }
  0x4d   : > { %790 = vmatmul.msk.bf16.vlgmr.msra.gmra.mxu2 %vm330_vm8, %v404_v46  ;;  %v548_v46 = vrot.slane %v544_v27, 1 }
  0x4e   : > { %v305_v48 = vsel %vm293_vm10, %v300_v43, %v304_v47 }
  0x4f   : > { %756 = vmatmul.msk.bf16.vlgmr.msra.gmra.mxu0 %vm330_vm8, %v305_v48 }
  0xc2   : > { %v383_v49 = vpop.f32.mrf.mxu1 }
  0xca   : > { %v385_v55 = vpop.f32.mrf.mxu1 }
  0xcc   : > { %v343_v50 = vpop.f32.mrf.mxu0 }
  0xcd   : > { %v384_v51 = vadd.f32 %v383_v49, %v343_v50 }
  0xd0   : > { %v441_v52 = vpop.f32.mrf.mxu2 }
  0xd1   : > { %v446_v53 = vadd.f32 %v441_v52, %v384_v51 }
  0xd3   : > { %450 = vrot.lane.b32.xlu0 %v446_v53, %s1064_s18 }
  0xd4   : > { %v345_v54 = vpop.f32.mrf.mxu0 }
  0xd5   : > { %v386_v56 = vadd.f32 %v385_v55, %v345_v54  ;;  %v569_v54 = vrot.slane %v1229_v62, 6 }
  0xd8   : > { %v443_v57 = vpop.f32.mrf.mxu2 }
  0xd9   : > { %v447_v58 = vadd.f32 %v443_v57, %v386_v56 }
  0xdb   : > { %452 = vrot.lane.b32.xlu0 %v447_v58, %s1064_s18 }
 0x145   : > { %v451_v63 = vpop.permute.xlu0 %450 }
 0x146   : > { %v456_v0 = vmax.f32 %v446_v53, %v451_v63 }
 0x148   : > { %v460_v3 = vrot.slane %v456_v0, 2  ;;  %v461_v4 = vrot.slane %v456_v0, 4  ;;  %v462_v5 = vrot.slane %v456_v0, 6  ;;  %v791_v6 = vrot.slane %v456_v0, 9 }
 0x14a   : > { %v792_v11 = vrot.slane %v460_v3, 9  ;;  %v793_v12 = vrot.slane %v461_v4, 9  ;;  %v794_v13 = vrot.slane %v462_v5, 9  ;;  %v496_v14 = vmax.f32 %v456_v0, %v791_v6 }
 0x14c   : > { %v497_v19 = vmax.f32 %v460_v3, %v792_v11  ;;  %v498_v20 = vmax.f32 %v461_v4, %v793_v12  ;;  %v499_v21 = vmax.f32 %v462_v5, %v794_v13  ;;  %v524_v22 = vadd.f32 %v1224_v59, %v496_v14 }
 0x14d   : > { %v453_v26 = vpop.permute.xlu0 %452  ;;  %v572_v4 = vrot.slane %v568_v33, 1  ;;  %v573_v5 = vrot.slane %v569_v54, 1 }
 0x14e   : > { %v525_v28 = vadd.f32 %v512_v1, %v497_v19  ;;  %v526_v29 = vadd.f32 %v509_v61, %v498_v20  ;;  %v527_v30 = vadd.f32 %v513_v7, %v499_v21  ;;  %v532_v31 = vmax.f32 %v524_v22, 0.0 }
 0x14f   : > { %v457_v34 = vmax.f32 %v447_v58, %v453_v26 }
 0x150   : > { %v533_v35 = vmax.f32 %v525_v28, 0.0  ;;  %v534_v36 = vmax.f32 %v526_v29, 0.0  ;;  %v535_v37 = vmax.f32 %v527_v30, 0.0  ;;  %v557_v38 = vmul.f32 %v1226_v60, %v532_v31 }
 0x151   : > { %v463_v39 = vrot.slane %v457_v34, 2  ;;  %v464_v40 = vrot.slane %v457_v34, 4  ;;  %v465_v41 = vrot.slane %v457_v34, 6  ;;  %v795_v42 = vrot.slane %v457_v34, 9 }
 0x152   : > { %v558_v43 = vmul.f32 %v545_v15, %v533_v35  ;;  %v559_v44 = vmul.f32 %v542_v2, %v534_v36  ;;  %v582_v45 = vadd.f32 %v1229_v62, %v557_v38  ;;  %v560_v51 = vmul.f32 %v546_v16, %v535_v37 }
 0x153   : > { %v796_v47 = vrot.slane %v463_v39, 9  ;;  %v797_v48 = vrot.slane %v464_v40, 9  ;;  %v798_v49 = vrot.slane %v465_v41, 9  ;;  %v500_v50 = vmax.f32 %v457_v34, %v795_v42 }
 0x154   : > { %v583_v52 = vadd.f32 %v570_v17, %v558_v43  ;;  %v584_v53 = vadd.f32 %v567_v8, %v559_v44  ;;  %v598_v59 = vperm.slane %v582_v45, 0  ;;  %v585_v3 = vadd.f32 %v571_v23, %v560_v51 }
 0x155   : > { %v501_v55 = vmax.f32 %v463_v39, %v796_v47  ;;  %v502_v56 = vmax.f32 %v464_v40, %v797_v48  ;;  %v503_v57 = vmax.f32 %v465_v41, %v798_v49  ;;  %v528_v58 = vadd.f32 %v510_v9, %v500_v50 }
 0x156   : > { %v599_v60 = vperm.slane %v583_v52, 0  ;;  %v600_v61 = vperm.slane %v584_v53, 0 }
 0x157   : > { %v529_v63 = vadd.f32 %v514_v24, %v501_v55  ;;  %v530_v0 = vadd.f32 %v511_v10, %v502_v56  ;;  %v531_v1 = vadd.f32 %v515_v25, %v503_v57  ;;  %v536_v2 = vmax.f32 %v528_v58, 0.0 }
 0x158   : > { %v607_v6 = vsel %vm606_vm11, %v599_v60, %v598_v59  ;;  %v601_v10 = vperm.slane %v585_v3, 0 }
 0x159   : > { %v537_v7 = vmax.f32 %v529_v63, 0.0  ;;  %v538_v62 = vmax.f32 %v530_v0, 0.0  ;;  %v539_v8 = vmax.f32 %v531_v1, 0.0  ;;  %v561_v11 = vmul.f32 %v543_v18, %v536_v2 }
 0x15a   : > { %v609_v9 = vsel %vm608_vm12, %v600_v61, %v607_v6 }
 0x15b   : > { %v562_v12 = vmul.f32 %v547_v32, %v537_v7  ;;  %v586_v13 = vadd.f32 %v568_v33, %v561_v11  ;;  %v563_v14 = vmul.f32 %v544_v27, %v538_v62  ;;  %v564_v15 = vmul.f32 %v548_v46, %v539_v8 }
 0x15c   : > { %v611_v21 = vsel %vm610_vm13, %v601_v10, %v609_v9 }
 0x15d   : > { %v602_v16 = vperm.slane %v586_v13, 0  ;;  %v587_v17 = vadd.f32 %v572_v4, %v562_v12  ;;  %v588_v19 = vadd.f32 %v569_v54, %v563_v14  ;;  %v589_v20 = vadd.f32 %v573_v5, %v564_v15 }
 0x15f   : > { %v603_v18 = vperm.slane %v587_v17, 0  ;;  %v604_v22 = vperm.slane %v588_v19, 0  ;;  %v613_v23 = vsel %vm612_vm14, %v602_v16, %v611_v21  ;;  %v605_v24 = vperm.slane %v589_v20, 0 }
 0x161   : > { %v615_v25 = vsel %vm614_vm15, %v603_v18, %v613_v23 }
 0x162   : > { %v617_v26 = vsel %vm616_vm0, %v604_v22, %v615_v25 }
 0x163   : > { %v619_v27 = vsel %vm618_vm1, %v605_v24, %v617_v26 }
 0x164   : > { %621 = vst.msk [vmem:[%s221_s16] sm:$0xff] %vm330_vm8, %v619_v27 }
 0x165   : > { %1014 = shalt.err (!%p1011_p10)
}
 0x166   : > { %833 = dma.vmem_to_hbm [thread:$0]  (%p1154_p3), %s636_s27, 128, %s638_s28, %s623_s4  }
 0x167 PF: > { %s649_s11 = sand.u32 1, %s1045_s12   ;;  %p1295_p12 = scmp.ge.s32.totalorder %s1057_s15, 2 }
 0x168   : > { %s650_s25 = scalar_lea.sflag [#allocation5], %s649_s11 }
 0x169   : > { %p847_p13 = pnand %p1295_p12, %p1120_p6 }
 0x16b   : > { %p848_p0 = pneg %p847_p13 }
 0x16d   : > { %1040 = dma.done.wait (%p848_p0), %s650_s25, 128  }
 0x16e   : > { %1042 = vsyncadd (%p848_p0), %s650_s25, 4294967168  ;;  %p17_p5 = scmp.ge.s32.totalorder %s1144_s6, 4   ;;  %s1296_s12 = smov %s1049_s13 }
 0x16f   : > { %s1297_s13 = smov %s1053_s14  ;;  %s1298_s14 = smov %s1160_s10 }
 0x170   : > { %s1299_s15 = smov %s1144_s6  ;;  %19 = sbr.rel (!%p17_p5) target bundleno = 6 (0x6), region = 87 }
 0x175   :  { %656 = vsyncpa [#allocation4], 1 }
 0x176   :  { %658 = vsyncpa [#allocation4 + $0x1], 1 }
 0x177   :  { %659 = vsyncpa [#allocation7], 1 }
 0x178   :  { %660 = vsyncpa [#allocation5], 1 }
 0x179   :  { %662 = vsyncpa [#allocation5 + $0x1], 1 }

</bundles_post_ra>
